<compile_context>
chip_gen: v7x
topology: tpu7x:2x2x1
jax: 0.10.0
libtpu: 0.0.40
codegen_flags: <defaults>
</compile_context>

<pallas_src>
import math
import functools

import jax
import jax.numpy as jnp
from jax.experimental import pallas as pl
from jax.experimental.pallas import tpu as pltpu


# ----------------------------------------------------------------------------
# Small helpers
# ----------------------------------------------------------------------------
def _cdiv(a: int, b: int) -> int:
    return -(-a // b)


def _round_up(x: int, m: int) -> int:
    return _cdiv(x, m) * m


def _row_align(itemsize: int) -> int:
    # sublane-friendly row multiples per dtype packing (bf16 packs 2 rows/sublane)
    if itemsize == 1:
        return 32
    if itemsize == 2:
        return 16
    return 8


def _device_kind() -> str:
    try:
        return jax.devices()[0].device_kind.lower()
    except Exception:
        return ""


# ----------------------------------------------------------------------------
# Hadamard matrix construction (host-side, tiny)
# ----------------------------------------------------------------------------
def _hadamard_matrix(n: int) -> jnp.ndarray:
    """Sylvester-ordered Hadamard matrix H_n (entries +-1), float32."""
    # TODO(synk): fast_hadamard_transform also supports had_dim = 12/20/28 * 2^k;
    # only power-of-2 sizes are implemented here.
    assert n > 0 and (n & (n - 1)) == 0, "Hadamard dim must be a power of 2"
    H = jnp.ones((1, 1), jnp.float32)
    while H.shape[0] < n:
        H = jnp.concatenate(
            [jnp.concatenate([H, H], axis=1),
             jnp.concatenate([H, -H], axis=1)], axis=0)
    return H


def _block_hadamard(width: int, d: int) -> jnp.ndarray:
    """Block-diagonal kron(I_{width//d}, H_d) (f32, entries +-1/0)."""
    H = _hadamard_matrix(d)
    m = width // d
    if m == 1:
        return H
    return jnp.kron(jnp.eye(m, dtype=jnp.float32), H)


def _choose_width(head_dim: int, d: int, total_q: int, total_k: int,
                  allow_256: bool) -> int:
    """Lane width for the packed (rows, W) view.

    W must be a multiple of the Hadamard block d and divide both totals.
    Prefer 256 on 256-wide-MXU chips (v6e/v7x), then 128 (lane-dense, unmasked
    stores), else fall back to head_dim (always valid)."""
    cands = ([256] if allow_256 else []) + [128, head_dim]
    for w in cands:
        if w % d == 0 and total_q % w == 0 and total_k % w == 0:
            return w
    return head_dim


# ----------------------------------------------------------------------------
# Tile / grid planning (generation-aware VMEM budget)
# ----------------------------------------------------------------------------
def _plan_tiles(rows_q: int, rows_k: int, W: int,
                q_item: int, k_item: int, out_item: int):
    kind = _device_kind()
    is_v7 = ("v7" in kind) or ("7x" in kind)
    if is_v7:                       # 64 MiB physical / 32 MiB scoped default
        budget, cap, limit, min_steps = 24 << 20, 8192, 48 << 20, 2
    elif "v6" in kind or "v5" in kind:   # 128 MiB physical
        budget, cap, limit, min_steps = 48 << 20, 16384, 80 << 20, 1
    else:                           # unknown generation: stay conservative
        budget, cap, limit, min_steps = 12 << 20, 4096, None, 1
    try:  # refine with the actual VMEM capacity when the query is available
        vmem_cap = pltpu.get_tpu_info().vmem_capacity_bytes
        budget = min(budget, int(vmem_cap * 0.4))
        if limit is not None:
            limit = min(limit, int(vmem_cap * 0.75))
    except Exception:
        pass

    aq, ak = _row_align(q_item), _row_align(k_item)
    # per-row pipelined bytes: input + output double-buffered, plus f32 dot temp
    per_q = W * (2 * q_item + 2 * out_item + 4)
    per_k = W * (2 * k_item + 2 * out_item + 4)

    n = max(1,
            _cdiv(rows_q * per_q + rows_k * per_k, budget),
            _cdiv(rows_q, cap), _cdiv(rows_k, cap))
    # v7x: give the "parallel" axis at least 2 steps so both TCs get work.
    if n < min_steps and rows_q >= min_steps * aq and rows_k >= min_steps * ak:
        n = min_steps

    def tile(rows, align):
        if n == 1:
            return rows                      # full-dim block: always legal
        return min(_round_up(_cdiv(rows, n), align), rows)

    return n, tile(rows_q, aq), tile(rows_k, ak), limit


# ----------------------------------------------------------------------------
# Pallas kernel: one q row-tile + one k row-tile per grid step
# ----------------------------------------------------------------------------
def _qk_hadamard_kernel(q_ref, k_ref, h_ref, qo_ref, ko_ref, *, scale):
    h = h_ref[...]          # +-1/0 entries: exact in bf16, so casts are exact
    q = q_ref[...]
    hq = h if q.dtype == h.dtype else h.astype(q.dtype)
    yq = jnp.dot(q, hq, preferred_element_type=jnp.float32)
    qo_ref[...] = (yq * scale).astype(qo_ref.dtype)
    # k stays in its source dtype (f32 k -> f32 transform, like torch .float()).
    k = k_ref[...]
    hk = h if k.dtype == h.dtype else h.astype(k.dtype)
    yk = jnp.dot(k, hk, preferred_element_type=jnp.float32)
    ko_ref[...] = (yk * scale).astype(ko_ref.dtype)


def qk_hadamard_pallas(q2: jnp.ndarray, k2: jnp.ndarray, H: jnp.ndarray,
                       scale: float, out_dtype):
    """Apply (x @ H) * scale row-wise to q2 and k2 (each (rows, W)) in one
    fused pallas_call; outputs are cast to out_dtype (= q.dtype)."""
    rows_q, W = q2.shape
    rows_k, Wk = k2.shape
    assert W == Wk and H.shape == (W, W)
    q_item = q2.dtype.itemsize
    k_item = k2.dtype.itemsize
    out_item = jnp.dtype(out_dtype).itemsize

    n, tq, tk, vmem_limit = _plan_tiles(rows_q, rows_k, W, q_item, k_item,
                                        out_item)
    nq_valid, nk_valid = _cdiv(rows_q, tq), _cdiv(rows_k, tk)

    def row_spec(n_valid, t):
        if n_valid >= n:
            imap = lambda i: (i, 0)
        else:
            # Safety net (pathological row-count ratios): clamp so no block is
            # fully out of bounds; repeated blocks rewrite identical data.
            imap = lambda i: (jnp.minimum(i, n_valid - 1), 0)
        return pl.BlockSpec((t, W), imap)

    # Repeated (clamped) output blocks must stay on one core.
    parallel_ok = (nq_valid >= n) and (nk_valid >= n)
    semantics = ("parallel",) if parallel_ok else ("arbitrary",)

    cost = pl.CostEstimate(
        flops=2 * (rows_q + rows_k) * W * W,
        transcendentals=0,
        bytes_accessed=(rows_q * W * (q_item + out_item)
                        + rows_k * W * (k_item + out_item)
                        + W * W * H.dtype.itemsize))

    return pl.pallas_call(
        functools.partial(_qk_hadamard_kernel, scale=scale),
        out_shape=(jax.ShapeDtypeStruct((rows_q, W), out_dtype),
                   jax.ShapeDtypeStruct((rows_k, W), out_dtype)),
        grid_spec=pltpu.PrefetchScalarGridSpec(
            num_scalar_prefetch=0,
            grid=(n,),
            in_specs=[
                row_spec(nq_valid, tq),                 # q row tile
                row_spec(nk_valid, tk),                 # k row tile
                pl.BlockSpec((W, W), lambda i: (0, 0)),  # (block-)Hadamard
            ],
            out_specs=[
                row_spec(nq_valid, tq),
                row_spec(nk_valid, tk),
            ],
        ),
        compiler_params=pltpu.CompilerParams(
            dimension_semantics=semantics,
            vmem_limit_bytes=vmem_limit),
        cost_estimate=cost,
    )(q2, k2, H)


# ----------------------------------------------------------------------------
# Module wrapper
# ----------------------------------------------------------------------------
class QKRotationWrapper:
    """JAX/Pallas equivalent of the torch QKRotationWrapper forward pass."""

    def __init__(self, func, config=None, had_dim: int = -1, *args, **kwargs):
        self.config = config
        self.func = func          # wrapped q/k producer (identity here)
        self.had_dim = had_dim

    def __call__(self, *args, **kwargs):
        # TODO(synk): for maximum perf, fuse this Hadamard matmul into the
        # wrapped `func` (RoPE / q-k producer) kernel -- this pass is pure HBM
        # streaming, so its entire cost is one extra read+write of q and k.
        q, k = self.func(*args, **kwargs)
        dtype = q.dtype
        q_shape = q.shape
        bsz, num_heads, seq_len, head_dim = k.shape
        assert q_shape[-1] == head_dim

        d = self.had_dim if self.had_dim > 0 else head_dim
        assert head_dim % d == 0
        scale = 1.0 / math.sqrt(d)

        kind = _device_kind()
        allow_256 = ("v6" in kind) or ("v7" in kind) or ("7x" in kind)
        W = _choose_width(head_dim, d, q.size, k.size, allow_256)

        # Block-diagonal kron(I_{W/d}, H_d) keeps the last axis lane-dense.
        H = _block_hadamard(W, d)
        if q.dtype == k.dtype and q.dtype != jnp.float32:
            H = H.astype(q.dtype)     # exact (+-1/0); skips the in-kernel cast

        q2 = q.reshape(-1, W)
        k2 = k.reshape(-1, W)         # no pre-cast: kernel reads source dtype
        q_out2, k_out2 = qk_hadamard_pallas(q2, k2, H, scale, dtype)

        q_out = q_out2.reshape(q_shape)
        k_out = k_out2.reshape(bsz, num_heads, seq_len, head_dim)
        return q_out, k_out


# ----------------------------------------------------------------------------
# Pure-JAX reference + self-test
# ----------------------------------------------------------------------------
def _hadamard_reference(x, d, scale, out_dtype):
    H = _hadamard_matrix(d)
    y = (x.astype(jnp.float32).reshape(-1, d) @ H) * scale
    return y.reshape(x.shape).astype(out_dtype)


if __name__ == "__main__":
    key = jax.random.PRNGKey(0)
    kq, kk, kq2 = jax.random.split(key, 3)

    bsz, num_heads, seq_len, head_dim = 2, 4, 8, 32
    q = jax.random.normal(kq, (bsz, num_heads, seq_len, head_dim),
                          jnp.float32).astype(jnp.bfloat16)
    k = jax.random.normal(kk, (bsz, num_heads, seq_len, head_dim),
                          jnp.float32).astype(jnp.bfloat16)

    # The wrapped `func` (e.g. RoPE-applied q/k producer) is identity here.
    identity_func = lambda q_, k_: (q_, k_)

    # Case 1: had_dim = -1 -> full head_dim Hadamard
    wrapper_full = QKRotationWrapper(identity_func, config=None, had_dim=-1)
    q_out, k_out = wrapper_full(q, k)
    jax.block_until_ready((q_out, k_out))

    # Case 2: had_dim = 8 -> blocked Hadamard over groups of 8 within head_dim
    wrapper_blk = QKRotationWrapper(identity_func, config=None, had_dim=8)
    q_out_b, k_out_b = wrapper_blk(q, k)
    jax.block_until_ready((q_out_b, k_out_b))

    # Case 3: GQA-style shapes (q has more heads than k), had_dim = 8
    q_g = jax.random.normal(kq2, (bsz, 8, seq_len, head_dim),
                            jnp.float32).astype(jnp.bfloat16)
    q_out_g, k_out_g = wrapper_blk(q_g, k)
    jax.block_until_ready((q_out_g, k_out_g))

    # Case 4: mixed dtypes -- k arrives in f32, transform runs in f32 in-kernel
    k_f32 = k.astype(jnp.float32)
    q_out_m, k_out_m = wrapper_full(q, k_f32)
    jax.block_until_ready((q_out_m, k_out_m))

    # Correctness checks against pure-JAX reference.
    def check(out, ref):
        assert out.shape == ref.shape and out.dtype == ref.dtype
        assert jnp.allclose(out.astype(jnp.float32), ref.astype(jnp.float32),
                            atol=1e-2, rtol=1e-2)

    s_full = 1.0 / math.sqrt(head_dim)
    s_blk = 1.0 / math.sqrt(8)
    check(q_out, _hadamard_reference(q, head_dim, s_full, q.dtype))
    check(k_out, _hadamard_reference(k, head_dim, s_full, q.dtype))
    check(q_out_b, _hadamard_reference(q, 8, s_blk, q.dtype))
    check(k_out_b, _hadamard_reference(k, 8, s_blk, q.dtype))
    check(q_out_g, _hadamard_reference(q_g, 8, s_blk, q.dtype))
    check(k_out_g, _hadamard_reference(k, 8, s_blk, q.dtype))
    check(q_out_m, _hadamard_reference(q, head_dim, s_full, q.dtype))
    check(k_out_m, _hadamard_reference(k_f32, head_dim, s_full, q.dtype))

    print("KERNEL_OK")
</pallas_src>

<mosaic_0001>
module attributes {stable_mosaic.version = 11 : i64} {
  func.func @_qk_hadamard_kernel(%arg0: i32, %arg1: memref<16x128xbf16, #tpu.memory_space<vmem>>, %arg2: memref<16x128xbf16, #tpu.memory_space<vmem>>, %arg3: memref<128x128xbf16, #tpu.memory_space<vmem>>, %arg4: memref<16x128xbf16, #tpu.memory_space<vmem>>, %arg5: memref<16x128xbf16, #tpu.memory_space<vmem>>) attributes {dimension_semantics = [#tpu.dimension_semantics<parallel>], iteration_bounds = array<i64: 1>, scalar_prefetch = 0 : i64, scratch_operands = 0 : i64, tpu.core_type = #tpu.core_type<tc>, window_params = [{transform_indices = @transform_0, window_bounds = array<i64: 16, 128>}, {transform_indices = @transform_1, window_bounds = array<i64: 16, 128>}, {pipeline_mode = #tpu.pipeline_mode<synchronous>, transform_indices = @transform_2, window_bounds = array<i64: 128, 128>}, {transform_indices = @transform_3, window_bounds = array<i64: 16, 128>}, {transform_indices = @transform_4, window_bounds = array<i64: 16, 128>}]} {
    %c0 = arith.constant 0 : index
    %c0_0 = arith.constant 0 : index
    %0 = vector.load %arg3[%c0, %c0_0] : memref<128x128xbf16, #tpu.memory_space<vmem>>, vector<128x128xbf16>
    %c0_1 = arith.constant 0 : index
    %c0_2 = arith.constant 0 : index
    %1 = vector.load %arg1[%c0_1, %c0_2] : memref<16x128xbf16, #tpu.memory_space<vmem>>, vector<16x128xbf16>
    %cst = arith.constant dense<0.000000e+00> : vector<16x128xf32>
    %2 = tpu.matmul %1, %0, %cst {dimension_numbers = #tpu.dot_dimension_numbers<[1], [0], [0], [1], [0, 0, 1, 1], [], []>} : vector<16x128xbf16>, vector<128x128xbf16>, vector<16x128xf32> -> vector<16x128xf32>
    %cst_3 = arith.constant 0.176776692 : f32
    %3 = vector.broadcast %cst_3 : f32 to vector<16x128xf32>
    %4 = arith.mulf %2, %3 : vector<16x128xf32>
    %5 = arith.truncf %4 : vector<16x128xf32> to vector<16x128xbf16>
    %c0_4 = arith.constant 0 : index
    %c0_5 = arith.constant 0 : index
    %6 = vector.load %arg4[%c0_4, %c0_5] : memref<16x128xbf16, #tpu.memory_space<vmem>>, vector<16x128xbf16>
    tpu.vector_store %arg4[%c0_4, %c0_5], %5 {strides = array<i32>} : memref<16x128xbf16, #tpu.memory_space<vmem>>, vector<16x128xbf16>,
    %c0_6 = arith.constant 0 : index
    %c0_7 = arith.constant 0 : index
    %7 = vector.load %arg2[%c0_6, %c0_7] : memref<16x128xbf16, #tpu.memory_space<vmem>>, vector<16x128xbf16>
    %cst_8 = arith.constant dense<0.000000e+00> : vector<16x128xf32>
    %8 = tpu.matmul %7, %0, %cst_8 {dimension_numbers = #tpu.dot_dimension_numbers<[1], [0], [0], [1], [0, 0, 1, 1], [], []>} : vector<16x128xbf16>, vector<128x128xbf16>, vector<16x128xf32> -> vector<16x128xf32>
    %cst_9 = arith.constant 0.176776692 : f32
    %9 = vector.broadcast %cst_9 : f32 to vector<16x128xf32>
    %10 = arith.mulf %8, %9 : vector<16x128xf32>
    %11 = arith.truncf %10 : vector<16x128xf32> to vector<16x128xbf16>
    %c0_10 = arith.constant 0 : index
    %c0_11 = arith.constant 0 : index
    %12 = vector.load %arg5[%c0_10, %c0_11] : memref<16x128xbf16, #tpu.memory_space<vmem>>, vector<16x128xbf16>
    tpu.vector_store %arg5[%c0_10, %c0_11], %11 {strides = array<i32>} : memref<16x128xbf16, #tpu.memory_space<vmem>>, vector<16x128xbf16>,
    return
  }
  func.func @transform_0(%arg0: i32) -> (i32, i32) {
    %c0_i32 = arith.constant 0 : i32
    %c0_i32_0 = arith.constant 0 : i32
    return %arg0, %c0_i32 : i32, i32
  }
  func.func @transform_1(%arg0: i32) -> (i32, i32) {
    %c0_i32 = arith.constant 0 : i32
    %c0_i32_0 = arith.constant 0 : i32
    return %arg0, %c0_i32 : i32, i32
  }
  func.func @transform_2(%arg0: i32) -> (i32, i32) {
    %c0_i32 = arith.constant 0 : i32
    %c0_i32_0 = arith.constant 0 : i32
    %c0_i32_1 = arith.constant 0 : i32
    return %c0_i32, %c0_i32_0 : i32, i32
  }
  func.func @transform_3(%arg0: i32) -> (i32, i32) {
    %c0_i32 = arith.constant 0 : i32
    %c0_i32_0 = arith.constant 0 : i32
    return %arg0, %c0_i32 : i32, i32
  }
  func.func @transform_4(%arg0: i32) -> (i32, i32) {
    %c0_i32 = arith.constant 0 : i32
    %c0_i32_0 = arith.constant 0 : i32
    return %arg0, %c0_i32 : i32, i32
  }
}

</mosaic_0001>

<bundles_post_ra>
// kernel: tpu_custom_call.1
= control target key start
LH: loop header
LB: loop body
LE: loop exit
PB: predicated region body
PF: predicated region fallthrough
CT: control target
= control target key end

     0   :  { %10 = vsyncpa [#allocation3], 0  ;;  %s626_s0 = inlined_call_operand.hbm [shape: bf16[16,128], index: 0, kind: input, shape index: {}]   ;;  %s627_s1 = inlined_call_operand.hbm [shape: bf16[16,128], index: 1, kind: input, shape index: {}]   ;;  %s628_s2 = inlined_call_operand.hbm [shape: bf16[128,128], index: 2, kind: input, shape index: {}]   ;;  %s629_s3 = inlined_call_operand.hbm [shape: bf16[16,128], index: 3, kind: output, shape index: {0}]   ;;  %s630_s4 = inlined_call_operand.hbm [shape: bf16[16,128], index: 4, kind: output, shape index: {1}]  }
   0x1   :  { %11 = vsyncpa [#allocation6], 0 }
   0x2   :  { %12 = vsyncpa [#allocation4], 0 }
   0x3   :  { %13 = vsyncpa [#allocation10], 0  ;;  %s503_s15 = smov [#allocation5]   ;;  %s504_s17 = smov [#allocation2]  }
   0x4   :  { %s31_s16 = sshll.u32 %s503_s15, 4  ;;  %s19_s18 = sshll.u32 %s504_s17, 4  ;;  %s32_s16 = int_to_ptr.vmem [resolvable:$true] %s31_s16  ;;  %s537_s18 = int_to_ptr.vmem [resolvable:$true] %s19_s18 }
   0x5   :  { %s385_s21 = scalar_lea.hbm %s627_s1, 128 }
   0x6   :  { %p386_p0 = scmp.ne.s32.totalorder %s627_s1, %s385_s21  ;;  %p389_p1 = scmp.lt.u32.totalorder %s385_s21, %s627_s1 }
   0x8   :  { %p391_p2 = pnand %p389_p1, %p386_p0 }
   0xa   :  { %394 = shalt.err (!%p391_p2)
}
   0xb   :  { %s395_s26 = scalar_lea.vmem %s32_s16, 128  ;;  %p400_p4 = scmp.lt.s32.totalorder %s32_s16, %s32_s16 }
   0xc   :  { %p396_p3 = scmp.ne.s32.totalorder %s32_s16, %s395_s26  ;;  %p401_p5 = scmp.lt.s32.totalorder %s395_s26, %s395_s26 }
   0xe   :  { %p402_p6 = por %p401_p5, %p400_p4 }
  0x10   :  { %p403_p7 = pnand %p402_p6, %p396_p3 }
  0x12   :  { %406 = shalt.err (!%p403_p7)
}
  0x13   :  { %s505_s27 = smov 64   ;;  %s506_s28 = smov 4  }
  0x14   :  { %37 = dma.hbm_to_vmem [thread:$0]  %s627_s1, 128, %s32_s16, [#allocation6], %s505_s27, %s505_s27, %s506_s28  }
  0x15   :  { %s407_s7 = scalar_lea.hbm %s626_s0, 128 }
  0x16   :  { %p408_p8 = scmp.ne.s32.totalorder %s626_s0, %s407_s7  ;;  %p411_p9 = scmp.lt.u32.totalorder %s407_s7, %s626_s0 }
  0x18   :  { %p413_p10 = pnand %p411_p9, %p408_p8 }
  0x1a   :  { %416 = shalt.err (!%p413_p10)
}
  0x1b   :  { %s417_s12 = scalar_lea.vmem %s537_s18, 128  ;;  %p422_p12 = scmp.lt.s32.totalorder %s537_s18, %s537_s18 }
  0x1c   :  { %p418_p11 = scmp.ne.s32.totalorder %s537_s18, %s417_s12  ;;  %p423_p13 = scmp.lt.s32.totalorder %s417_s12, %s417_s12 }
  0x1e   :  { %p424_p0 = por %p423_p13, %p422_p12 }
  0x20   :  { %p425_p1 = pnand %p424_p0, %p418_p11 }
  0x22   :  { %428 = shalt.err (!%p425_p1)
}
  0x23   :  { %25 = dma.hbm_to_vmem [thread:$0]  %s626_s0, 128, %s537_s18, [#allocation3], %s505_s27, %s505_s27, %s506_s28  }
  0x24   :  { %s507_s14 = smov [#allocation7]   ;;  %s429_s19 = scalar_lea.hbm %s628_s2, 1024 }
  0x25   :  { %s43_s15 = sshll.u32 %s507_s14, 4  ;;  %p430_p2 = scmp.ne.s32.totalorder %s628_s2, %s429_s19  ;;  %s44_s15 = int_to_ptr.vmem [resolvable:$true] %s43_s15 }
  0x26   :  { %p433_p3 = scmp.lt.u32.totalorder %s429_s19, %s628_s2 }
  0x28   :  { %p435_p4 = pnand %p433_p3, %p430_p2 }
  0x2a   :  { %438 = shalt.err (!%p435_p4)
}
  0x2b   :  { %s439_s24 = scalar_lea.vmem %s44_s15, 1024  ;;  %p444_p6 = scmp.lt.s32.totalorder %s44_s15, %s44_s15 }
  0x2c   :  { %p440_p5 = scmp.ne.s32.totalorder %s44_s15, %s439_s24  ;;  %p445_p7 = scmp.lt.s32.totalorder %s439_s24, %s439_s24 }
  0x2e   :  { %p446_p8 = por %p445_p7, %p444_p6 }
  0x30   :  { %p447_p9 = pnand %p446_p8, %p440_p5 }
  0x32   :  { %450 = shalt.err (!%p447_p9)
}
  0x33   :  { %49 = dma.hbm_to_vmem [thread:$0]  %s628_s2, 1024, %s44_s15, [#allocation6], %s505_s27, %s505_s27, %s506_s28  }
  0x34   :  { %495 = dma.done.wait [#allocation3], 128  }
  0x35   :  { %496 = vsyncadd [#allocation3], 4294967168 }
  0x36   :  { %497 = dma.done.wait [#allocation6], 1152  }
  0x37   :  { %498 = vsyncadd [#allocation6], 4294966144  ;;  %v508_v0 = vmov 0.0   ;;  %vm509_vm0 = vmmov 0   ;;  %v375_v1 = vld [vmem:[#allocation7] sm:$0xff]   ;;  %v376_v2 = vld [vmem:[#allocation7 + $0x8] sm:$0xff]  }
  0x38   :  { %326 = vmatprep.subr.bf16.mxu0 %v508_v0  ;;  %346 = vmatprep.subr.bf16.mxu1 %v508_v0  ;;  %v377_v3 = vld [vmem:[#allocation7 + $0x10] sm:$0xff]   ;;  %v378_v4 = vld [vmem:[#allocation7 + $0x18] sm:$0xff]   ;;  %v379_v5 = vld [vmem:[#allocation7 + $0x20] sm:$0xff]   ;;  %s510_s2 = smov [#allocation8]   ;;  %s511_s26 = smov [#allocation9]  }
  0x39   :  { %342 = vmatprep.mubr.msk.bf16.mxu0 %vm509_vm0, %v508_v0  ;;  %362 = vmatprep.mubr.msk.bf16.mxu1 %vm509_vm0, %v508_v0  ;;  %v380_v6 = vld [vmem:[#allocation7 + $0x28] sm:$0xff]   ;;  %v381_v7 = vld [vmem:[#allocation7 + $0x30] sm:$0xff]   ;;  %v382_v8 = vld [vmem:[#allocation7 + $0x38] sm:$0xff]   ;;  %s251_s25 = sshll.u32 %s510_s2, 4  ;;  %s263_s29 = sshll.u32 %s511_s26, 4  ;;  %s252_s25 = int_to_ptr.vmem [resolvable:$true] %s251_s25  ;;  %s589_s29 = int_to_ptr.vmem [resolvable:$true] %s263_s29 }
  0x3a   :  { %327 = vmatpush3.bf16.msra.mxu0 %v375_v1  ;;  %347 = vmatpush3.bf16.msra.mxu1 %v375_v1  ;;  %v383_v9 = vld [vmem:[#allocation2] sm:$0xff]   ;;  %v384_v10 = vld [vmem:[#allocation5] sm:$0xff]   ;;  %s451_s30 = scalar_lea.vmem %s252_s25, 128  ;;  %p456_p11 = scmp.lt.s32.totalorder %s252_s25, %s252_s25 }
  0x3b   :  { %328 = vmatprep.subr.bf16.mxu0 %v508_v0  ;;  %348 = vmatprep.subr.bf16.mxu1 %v508_v0  ;;  %p452_p10 = scmp.ne.s32.totalorder %s252_s25, %s451_s30  ;;  %p457_p12 = scmp.lt.s32.totalorder %s451_s30, %s451_s30 }
  0x3d   :  { %p458_p13 = por %p457_p12, %p456_p11 }
  0x3e   :  { %329 = vmatpush3.bf16.msra.mxu0 %v376_v2  ;;  %349 = vmatpush3.bf16.msra.mxu1 %v376_v2 }
  0x3f   :  { %330 = vmatprep.subr.bf16.mxu0 %v508_v0  ;;  %350 = vmatprep.subr.bf16.mxu1 %v508_v0  ;;  %p459_p0 = pnand %p458_p13, %p452_p10 }
  0x42   :  { %331 = vmatpush3.bf16.msra.mxu0 %v377_v3  ;;  %351 = vmatpush3.bf16.msra.mxu1 %v377_v3 }
  0x43   :  { %332 = vmatprep.subr.bf16.mxu0 %v508_v0  ;;  %352 = vmatprep.subr.bf16.mxu1 %v508_v0 }
  0x46   :  { %333 = vmatpush3.bf16.msra.mxu0 %v378_v4  ;;  %353 = vmatpush3.bf16.msra.mxu1 %v378_v4 }
  0x47   :  { %334 = vmatprep.subr.bf16.mxu0 %v508_v0  ;;  %354 = vmatprep.subr.bf16.mxu1 %v508_v0 }
  0x4a   :  { %335 = vmatpush3.bf16.msra.mxu0 %v379_v5  ;;  %355 = vmatpush3.bf16.msra.mxu1 %v379_v5 }
  0x4b   :  { %336 = vmatprep.subr.bf16.mxu0 %v508_v0  ;;  %356 = vmatprep.subr.bf16.mxu1 %v508_v0 }
  0x4e   :  { %337 = vmatpush3.bf16.msra.mxu0 %v380_v6  ;;  %357 = vmatpush3.bf16.msra.mxu1 %v380_v6 }
  0x4f   :  { %338 = vmatprep.subr.bf16.mxu0 %v508_v0  ;;  %358 = vmatprep.subr.bf16.mxu1 %v508_v0 }
  0x52   :  { %339 = vmatpush3.bf16.msra.mxu0 %v381_v7  ;;  %359 = vmatpush3.bf16.msra.mxu1 %v381_v7 }
  0x53   :  { %340 = vmatprep.subr.bf16.mxu0 %v508_v0  ;;  %360 = vmatprep.subr.bf16.mxu1 %v508_v0 }
  0x56   :  { %341 = vmatpush3.bf16.msra.mxu0 %v382_v8  ;;  %361 = vmatpush3.bf16.msra.mxu1 %v382_v8 }
  0x59   :  { %343 = vmatmul.mubr.bf16.vlgmr.msra.gmra.mrb[0].mxu0 %v383_v9  ;;  %363 = vmatmul.mubr.bf16.vlgmr.msra.gmra.mrb[0].mxu1 %v384_v10 }
 0x12c   :  { %v166_v11 = vpop.f32.mrb[0].mxu0  ;;  %v227_v12 = vpop.f32.mrb[0].mxu1 }
 0x12d   :  { %v344_v13 = vpop.f32.mrb[1].mxu0  ;;  %v364_v14 = vpop.f32.mrb[1].mxu1  ;;  %v173_v15 = vmul.f32 0.17677669, %v166_v11  ;;  %v234_v16 = vmul.f32 0.17677669, %v227_v12 }
 0x12e   :  { %v169_v17 = vpop.f32.mrb[2].mxu0  ;;  %v230_v18 = vpop.f32.mrb[2].mxu1 }
 0x12f   :  { %v174_v19 = vmul.f32 0.17677669, %v169_v17  ;;  %v235_v20 = vmul.f32 0.17677669, %v230_v18  ;;  %v345_v21 = vpop.f32.mrb[3].mxu0  ;;  %v365_v22 = vpop.f32.mrb[3].mxu1 }
 0x131   :  { %v301_v23 = vpack.c.bf16 %v174_v19, %v173_v15  ;;  %v306_v24 = vpack.c.bf16 %v235_v20, %v234_v16 }
 0x133   :  { %302 = vst [vmem:[#allocation8] sm:$0xff] %v301_v23   ;;  %307 = vst [vmem:[#allocation9] sm:$0xff] %v306_v24  }
 0x134   :  { %462 = shalt.err (!%p459_p0)
}
 0x135   :  { %s463_s7 = scalar_lea.hbm %s629_s3, 128 }
 0x136   :  { %p464_p1 = scmp.ne.s32.totalorder %s629_s3, %s463_s7  ;;  %p467_p2 = scmp.lt.u32.totalorder %s463_s7, %s629_s3 }
 0x138   :  { %p469_p3 = pnand %p467_p2, %p464_p1 }
 0x13a   :  { %472 = shalt.err (!%p469_p3)
}
 0x13b   :  { %257 = dma.vmem_to_hbm [thread:$0]  %s252_s25, 128, %s629_s3, [#allocation4], %s505_s27, %s505_s27, %s506_s28  }
 0x13c   :  { %s473_s13 = scalar_lea.vmem %s589_s29, 128  ;;  %p478_p5 = scmp.lt.s32.totalorder %s589_s29, %s589_s29 }
 0x13d   :  { %p474_p4 = scmp.ne.s32.totalorder %s589_s29, %s473_s13  ;;  %p479_p6 = scmp.lt.s32.totalorder %s473_s13, %s473_s13 }
 0x13f   :  { %p480_p7 = por %p479_p6, %p478_p5 }
 0x141   :  { %p481_p8 = pnand %p480_p7, %p474_p4 }
 0x143   :  { %484 = shalt.err (!%p481_p8)
}
 0x144   :  { %s485_s16 = scalar_lea.hbm %s630_s4, 128 }
 0x145   :  { %p486_p9 = scmp.ne.s32.totalorder %s630_s4, %s485_s16  ;;  %p489_p10 = scmp.lt.u32.totalorder %s485_s16, %s630_s4 }
 0x147   :  { %p491_p11 = pnand %p489_p10, %p486_p9 }
 0x149   :  { %494 = shalt.err (!%p491_p11)
}
 0x14a   :  { %269 = dma.vmem_to_hbm [thread:$0]  %s589_s29, 128, %s630_s4, [#allocation10], %s505_s27, %s505_s27, %s506_s28  }
 0x14b   :  { %499 = dma.done.wait [#allocation4], 128  }
 0x14c   :  { %500 = vsyncadd [#allocation4], 4294967168 }
 0x14d   :  { %501 = dma.done.wait [#allocation10], 128  }
 0x14e   :  { %502 = vsyncadd [#allocation10], 4294967168 }
 0x14f   :  { %276 = vsyncpa [#allocation3], 1 }
 0x150   :  { %277 = vsyncpa [#allocation6], 1 }
 0x151   :  { %278 = vsyncpa [#allocation4], 1 }
 0x152   :  { %279 = vsyncpa [#allocation10], 1 }

</bundles_post_ra>
